<compile_context>
chip_gen: v7x
topology: tpu7x:2x2x1
jax: 0.10.0
libtpu: 0.0.40
codegen_flags: <defaults>
</compile_context>

<pallas_src>
import functools
import math
from typing import NamedTuple, Optional, Tuple

import jax
import jax.numpy as jnp
from jax.experimental import pallas as pl
from jax.experimental.pallas import tpu as pltpu

_INV_SQRT_2 = 1.0 / math.sqrt(2.0)


def _round_up(a, b):
    return ((a + b - 1) // b) * b


# --------------------------------------------------------------------------
# Deterministic parameter init reproducing he_orthogonal_init (orthogonal ->
# standardize (mean 0, unbiased var 1 along dim=1) -> scale by sqrt(1/fan_in)).
# --------------------------------------------------------------------------
def _standardize(kernel):
    mean = jnp.mean(kernel, axis=1, keepdims=True)
    var = jnp.var(kernel, axis=1, keepdims=True, ddof=1)
    return (kernel - mean) / jnp.sqrt(var + 1e-6)


def he_orthogonal_init(key, out_features, in_features, dtype=jnp.float32):
    a = jax.random.normal(key, (out_features, in_features), dtype=jnp.float32)
    q, r = jnp.linalg.qr(a)
    d = jnp.diagonal(r)
    q = q * jnp.where(d >= 0, 1.0, -1.0)[None, :]   # deterministic, never zeroes a column
    w = _standardize(q)
    w = w * (1.0 / in_features) ** 0.5
    return w.astype(dtype)                           # (out_features, in_features)


# --------------------------------------------------------------------------
# One-time parameter preparation (hoisted out of the per-call path).
# --------------------------------------------------------------------------
class PreparedResidual(NamedTuple):
    weights: Tuple[jax.Array, ...]   # each (units, units), transposed to (in, out)
    activation: Optional[str]        # "silu" | "siqu" | None (scales already folded)


def prepare_weights(weights, activation="silu", compute_dtype=jnp.bfloat16):
    """Transpose to (in, out), fold constant scales, fold Identity chains, cast
    to bf16 for native-rate MXU matmuls (f32 accumulation happens in-kernel)."""
    if isinstance(activation, str):
        activation = activation.lower()
        if activation in ("swish", "silu"):
            activation = "silu"
    units = int(weights[0].shape[0])
    wts = []
    for w in weights:
        w = jnp.asarray(w, jnp.float32)
        assert w.shape == (units, units)
        wts.append(w.T)                               # (in, out)

    if activation is None and len(wts) > 1:
        # Identity activation: x @ W1.T @ ... @ Wn.T == x @ (W1.T @ ... @ Wn.T)
        combined = wts[0]
        for w in wts[1:]:
            combined = combined @ w
        wts = [combined]
    elif activation == "silu":
        # Fold layer l's ScaledSiLU 1/0.6 into layer l+1's weights.  The last
        # layer's 1/0.6 is merged with the 1/sqrt(2) epilogue in the kernel.
        wts = [wts[0]] + [w * (1.0 / 0.6) for w in wts[1:]]

    prepared = tuple(w.astype(compute_dtype) for w in wts)
    return PreparedResidual(weights=prepared, activation=activation)


# --------------------------------------------------------------------------
# Core-count query (megacore gating).  Defensive: any failure -> 1 core, which
# is always safe (no split).
# --------------------------------------------------------------------------
def _num_tensorcores():
    try:
        info = pltpu.get_tpu_info()
        for name in ("num_cores", "num_cores_per_chip", "core_count",
                     "tensorcore_count", "num_tensorcores"):
            v = getattr(info, name, None)
            if isinstance(v, int) and v > 0:
                return v
    except Exception:
        pass
    try:
        d = jax.local_devices()[0]
        v = getattr(d, "num_cores", None)
        if isinstance(v, int) and v > 0:
            return v
        if "v7" in str(getattr(d, "device_kind", "")).lower():
            return 2
    except Exception:
        pass
    return 1


# --------------------------------------------------------------------------
# Pallas kernel: the whole residual block fused, one invocation per row tile.
# --------------------------------------------------------------------------
def _residual_kernel(x_ref, *rest, n_layers, activation, c_x, c_h):
    w_refs = rest[:n_layers]
    o_ref = rest[n_layers]

    # First-layer MXU operand straight from the VMEM-resident input block;
    # x is not held live across the layer loop.
    h = x_ref[...].astype(jnp.bfloat16)
    a = None
    for l in range(n_layers):
        z = jnp.dot(h, w_refs[l][...], preferred_element_type=jnp.float32)
        if activation == "silu":
            a = z * jax.nn.sigmoid(z)            # 1/0.6 folded into weights / epilogue
        elif activation == "siqu":
            a = z * (z * jax.nn.sigmoid(z))
        else:                                    # Identity
            a = z
        if l + 1 < n_layers:
            h = a.astype(jnp.bfloat16)

    # Residual add: re-read the (already VMEM-resident) input block.
    out = x_ref[...].astype(jnp.float32) * c_x + a * c_h
    o_ref[...] = out.astype(o_ref.dtype)


def residual_layer(x, prepared: PreparedResidual, *, tile_rows=None):
    """x: (N, units).  prepared: output of prepare_weights()."""
    weights = prepared.weights
    activation = prepared.activation
    n_layers = len(weights)
    N, units = x.shape
    assert int(weights[0].shape[0]) == units and int(weights[0].shape[1]) == units

    itemsize = jnp.dtype(x.dtype).itemsize
    sub = 8 if itemsize >= 4 else 16             # sublane multiple for the I/O tiles
    weight_bytes = sum(int(w.size) * jnp.dtype(w.dtype).itemsize for w in weights)
    # TODO(synk): very large `units` (weights that do not fit VMEM-resident) would
    # need a K/N-tiled variant; GemNet uses units <= ~1024 so weights stay resident.

    # ------- row tiling: ~3 MiB activation blocks, sublane aligned -------
    auto_tile = tile_rows is None
    if auto_tile:
        budget = 40 << 20                                   # activation+weight VMEM budget
        per_block = max((budget - weight_bytes) // 8, 1 << 20)
        block_target = min(3 << 20, per_block)
        tile_rows = max(block_target // (units * itemsize), sub)
    tile_rows = min(_round_up(int(tile_rows), sub), 8192)
    tile_rows = min(tile_rows, _round_up(N, sub))

    # ------- megacore: only split when the chip actually has >1 TensorCore -------
    if auto_tile:
        n_cores = _num_tensorcores()
        if n_cores > 1:
            want_blocks = 3 * n_cores                       # >=3 blocks/core for overlap
            if pl.cdiv(N, tile_rows) < want_blocks:
                tile_rows = max(_round_up(pl.cdiv(N, want_blocks), sub), sub)

    grid = (pl.cdiv(N, tile_rows),)                         # ragged last block handled by Pallas

    # ------- epilogue constants (ScaledSiLU scale merged here) -------
    c_h = _INV_SQRT_2 / 0.6 if activation == "silu" else _INV_SQRT_2

    kernel = functools.partial(_residual_kernel, n_layers=n_layers,
                               activation=activation, c_x=_INV_SQRT_2, c_h=c_h)

    in_specs = [pl.BlockSpec((tile_rows, units), lambda i: (i, 0))]
    # Weights: whole-array, VMEM-resident, single copy (no double-buffering).
    in_specs += [pl.BlockSpec(memory_space=pltpu.MemorySpace.VMEM)
                 for _ in range(n_layers)]
    out_spec = pl.BlockSpec((tile_rows, units), lambda i: (i, 0))

    cost = pl.CostEstimate(
        flops=2 * N * units * units * n_layers,
        transcendentals=(N * units * n_layers) if activation else 0,
        bytes_accessed=2 * N * units * itemsize + weight_bytes,
    )

    # VMEM budget: in+out double-buffered blocks + resident weights + f32
    # intermediates, with headroom.  Capped against v7x's 64 MiB physical VMEM.
    block_bytes = tile_rows * units * itemsize
    f32_block = tile_rows * units * 4
    vmem_needed = 4 * block_bytes + weight_bytes + 3 * f32_block
    vmem_limit = int(min(max(vmem_needed + (4 << 20), 24 << 20), 64 << 20))

    return pl.pallas_call(
        kernel,
        out_shape=jax.ShapeDtypeStruct((N, units), x.dtype),
        grid_spec=pltpu.PrefetchScalarGridSpec(
            num_scalar_prefetch=0,
            grid=grid,
            in_specs=in_specs,
            out_specs=out_spec,
        ),
        compiler_params=pltpu.CompilerParams(
            dimension_semantics=("parallel",),
            vmem_limit_bytes=vmem_limit,
        ),
        cost_estimate=cost,
    )(x, *weights)


# --------------------------------------------------------------------------
# Pure-JAX (f32) reference for verification (no folding, matches PyTorch).
# --------------------------------------------------------------------------
def residual_layer_ref(x, weights, *, activation="silu"):
    if isinstance(activation, str):
        activation = activation.lower()
        if activation in ("swish", "silu"):
            activation = "silu"
    h = x.astype(jnp.float32)
    for w in weights:
        h = h @ jnp.asarray(w, jnp.float32).T
        if activation == "silu":
            h = (h * jax.nn.sigmoid(h)) * (1.0 / 0.6)
        elif activation == "siqu":
            h = h * (h * jax.nn.sigmoid(h))
    return ((x.astype(jnp.float32) + h) * _INV_SQRT_2).astype(x.dtype)


if __name__ == "__main__":
    key = jax.random.PRNGKey(0)

    def run_case(case_key, N, units, n_layers, activation, tile_rows=None):
        keys = jax.random.split(case_key, n_layers + 1)
        x = jax.random.normal(keys[0], (N, units), dtype=jnp.float32)
        weights = [he_orthogonal_init(k, units, units) for k in keys[1:]]
        prepared = prepare_weights(weights, activation=activation)   # one-time setup
        out = jax.block_until_ready(
            residual_layer(x, prepared, tile_rows=tile_rows))
        ref = residual_layer_ref(x, weights, activation=activation)
        assert out.shape == (N, units)
        # bf16 MXU operands vs f32 reference -> loosened tolerance.
        err = float(jnp.max(jnp.abs(out - ref)))
        assert jnp.allclose(out, ref, atol=3e-2, rtol=3e-2), (
            f"N={N} units={units} act={activation}: max abs err {err}")
        return err

    # Lane-dense main case (GemNet typically calls ResidualLayer with 'silu').
    run_case(jax.random.fold_in(key, 0), N=256, units=128, n_layers=2,
             activation="silu")
    # Sub-128 feature dim, no padding (block last dim == full array dim).
    run_case(jax.random.fold_in(key, 1), N=40, units=64, n_layers=2,
             activation="silu")
    # Explicit ragged last row block (N not a multiple of tile_rows).
    run_case(jax.random.fold_in(key, 2), N=200, units=128, n_layers=2,
             activation="silu", tile_rows=48)
    # Bare-module default activation (Identity) -> weights folded to one matmul.
    run_case(jax.random.fold_in(key, 3), N=256, units=128, n_layers=2,
             activation=None)
    # SiQU path.
    run_case(jax.random.fold_in(key, 4), N=64, units=128, n_layers=2,
             activation="siqu")

    print("KERNEL_OK")
</pallas_src>

<mosaic_0001>
module attributes {stable_mosaic.version = 11 : i64} {
  func.func @_residual_kernel(%arg0: i32, %arg1: memref<256x128xf32, #tpu.memory_space<vmem>>, %arg2: memref<128x128xbf16, #tpu.memory_space<vmem>>, %arg3: memref<128x128xbf16, #tpu.memory_space<vmem>>, %arg4: memref<256x128xf32, #tpu.memory_space<vmem>>) attributes {dimension_semantics = [#tpu.dimension_semantics<parallel>], iteration_bounds = array<i64: 1>, scalar_prefetch = 0 : i64, scratch_operands = 0 : i64, tpu.core_type = #tpu.core_type<tc>, window_params = [{transform_indices = @transform_0, window_bounds = array<i64: 256, 128>}, {pipeline_mode = #tpu.pipeline_mode<synchronous>, transform_indices = @transform_1, window_bounds = array<i64: 128, 128>}, {pipeline_mode = #tpu.pipeline_mode<synchronous>, transform_indices = @transform_2, window_bounds = array<i64: 128, 128>}, {transform_indices = @transform_3, window_bounds = array<i64: 256, 128>}]} {
    %c0 = arith.constant 0 : index
    %c0_0 = arith.constant 0 : index
    %0 = vector.load %arg1[%c0, %c0_0] : memref<256x128xf32, #tpu.memory_space<vmem>>, vector<256x128xf32>
    %1 = arith.truncf %0 : vector<256x128xf32> to vector<256x128xbf16>
    %c0_1 = arith.constant 0 : index
    %c0_2 = arith.constant 0 : index
    %2 = vector.load %arg2[%c0_1, %c0_2] : memref<128x128xbf16, #tpu.memory_space<vmem>>, vector<128x128xbf16>
    %cst = arith.constant dense<0.000000e+00> : vector<256x128xf32>
    %3 = tpu.matmul %1, %2, %cst {dimension_numbers = #tpu.dot_dimension_numbers<[1], [0], [0], [1], [0, 0, 1, 1], [], []>} : vector<256x128xbf16>, vector<128x128xbf16>, vector<256x128xf32> -> vector<256x128xf32>
    %4 = arith.negf %3 : vector<256x128xf32>
    %5 = math.exp %4 : vector<256x128xf32>
    %cst_3 = arith.constant 1.000000e+00 : f32
    %6 = vector.broadcast %cst_3 : f32 to vector<256x128xf32>
    %7 = arith.addf %6, %5 : vector<256x128xf32>
    %8 = arith.divf %6, %7 : vector<256x128xf32>
    %9 = arith.mulf %3, %8 : vector<256x128xf32>
    %10 = arith.truncf %9 : vector<256x128xf32> to vector<256x128xbf16>
    %c0_4 = arith.constant 0 : index
    %c0_5 = arith.constant 0 : index
    %11 = vector.load %arg3[%c0_4, %c0_5] : memref<128x128xbf16, #tpu.memory_space<vmem>>, vector<128x128xbf16>
    %cst_6 = arith.constant dense<0.000000e+00> : vector<256x128xf32>
    %12 = tpu.matmul %10, %11, %cst_6 {dimension_numbers = #tpu.dot_dimension_numbers<[1], [0], [0], [1], [0, 0, 1, 1], [], []>} : vector<256x128xbf16>, vector<128x128xbf16>, vector<256x128xf32> -> vector<256x128xf32>
    %13 = arith.negf %12 : vector<256x128xf32>
    %14 = math.exp %13 : vector<256x128xf32>
    %cst_7 = arith.constant 1.000000e+00 : f32
    %15 = vector.broadcast %cst_7 : f32 to vector<256x128xf32>
    %16 = arith.addf %15, %14 : vector<256x128xf32>
    %17 = arith.divf %15, %16 : vector<256x128xf32>
    %18 = arith.mulf %12, %17 : vector<256x128xf32>
    %c0_8 = arith.constant 0 : index
    %c0_9 = arith.constant 0 : index
    %19 = vector.load %arg1[%c0_8, %c0_9] : memref<256x128xf32, #tpu.memory_space<vmem>>, vector<256x128xf32>
    %cst_10 = arith.constant 0.707106769 : f32
    %20 = vector.broadcast %cst_10 : f32 to vector<256x128xf32>
    %21 = arith.mulf %19, %20 : vector<256x128xf32>
    %cst_11 = arith.constant 1.17851126 : f32
    %22 = vector.broadcast %cst_11 : f32 to vector<256x128xf32>
    %23 = arith.mulf %18, %22 : vector<256x128xf32>
    %24 = arith.addf %21, %23 : vector<256x128xf32>
    %c0_12 = arith.constant 0 : index
    %c0_13 = arith.constant 0 : index
    %25 = vector.load %arg4[%c0_12, %c0_13] : memref<256x128xf32, #tpu.memory_space<vmem>>, vector<256x128xf32>
    tpu.vector_store %arg4[%c0_12, %c0_13], %24 {strides = array<i32>} : memref<256x128xf32, #tpu.memory_space<vmem>>, vector<256x128xf32>,
    return
  }
  func.func @transform_0(%arg0: i32) -> (i32, i32) {
    %c0_i32 = arith.constant 0 : i32
    %c0_i32_0 = arith.constant 0 : i32
    return %arg0, %c0_i32 : i32, i32
  }
  func.func @transform_1(%arg0: i32) -> (i32, i32) {
    %c0_i32 = arith.constant 0 : i32
    %c0_i32_0 = arith.constant 0 : i32
    %c0_i32_1 = arith.constant 0 : i32
    return %c0_i32, %c0_i32_0 : i32, i32
  }
  func.func @transform_2(%arg0: i32) -> (i32, i32) {
    %c0_i32 = arith.constant 0 : i32
    %c0_i32_0 = arith.constant 0 : i32
    %c0_i32_1 = arith.constant 0 : i32
    return %c0_i32, %c0_i32_0 : i32, i32
  }
  func.func @transform_3(%arg0: i32) -> (i32, i32) {
    %c0_i32 = arith.constant 0 : i32
    %c0_i32_0 = arith.constant 0 : i32
    return %arg0, %c0_i32 : i32, i32
  }
}

</mosaic_0001>

<bundles_post_ra>
// kernel: tpu_custom_call.1
= control target key start
LH: loop header
LB: loop body
LE: loop exit
PB: predicated region body
PF: predicated region fallthrough
CT: control target
= control target key end

     0   :  { %8 = vsyncpa [#allocation3], 0  ;;  %s2163_s0 = inlined_call_operand.hbm [shape: f32[256,128], index: 0, kind: input, shape index: {}]   ;;  %s2164_s1 = inlined_call_operand.hbm [shape: bf16[128,128], index: 1, kind: input, shape index: {}]   ;;  %s2165_s2 = inlined_call_operand.hbm [shape: bf16[128,128], index: 2, kind: input, shape index: {}]   ;;  %s2166_s3 = inlined_call_operand.hbm [shape: f32[256,128], index: 3, kind: output, shape index: {}]  }
   0x1   :  { %9 = vsyncpa [#allocation6], 0 }
   0x2   :  { %10 = vsyncpa [#allocation4], 0  ;;  %s1787_s12 = smov [#allocation5]   ;;  %s1693_s16 = scalar_lea.hbm %s2164_s1, 1024 }
   0x3   :  { %s28_s13 = sshll.u32 %s1787_s12, 4  ;;  %p1694_p0 = scmp.ne.s32.totalorder %s2164_s1, %s1693_s16  ;;  %s29_s13 = int_to_ptr.vmem [resolvable:$true] %s28_s13 }
   0x4   :  { %p1697_p1 = scmp.lt.u32.totalorder %s1693_s16, %s2164_s1 }
   0x6   :  { %p1699_p2 = pnand %p1697_p1, %p1694_p0 }
   0x8   :  { %1702 = shalt.err (!%p1699_p2)
}
   0x9   :  { %s1703_s21 = scalar_lea.vmem %s29_s13, 1024  ;;  %p1708_p4 = scmp.lt.s32.totalorder %s29_s13, %s29_s13 }
   0xa   :  { %p1704_p3 = scmp.ne.s32.totalorder %s29_s13, %s1703_s21  ;;  %p1709_p5 = scmp.lt.s32.totalorder %s1703_s21, %s1703_s21 }
   0xc   :  { %p1710_p6 = por %p1709_p5, %p1708_p4 }
   0xe   :  { %p1711_p7 = pnand %p1710_p6, %p1704_p3 }
  0x10   :  { %1714 = shalt.err (!%p1711_p7)
}
  0x11   :  { %s1788_s22 = smov 64   ;;  %s1789_s23 = smov 4  }
  0x12   :  { %34 = dma.hbm_to_vmem [thread:$0]  %s2164_s1, 1024, %s29_s13, [#allocation6], %s1788_s22, %s1788_s22, %s1789_s23  }
  0x13   :  { %s1790_s26 = smov [#allocation2]   ;;  %s1715_s30 = scalar_lea.hbm %s2163_s0, 4096 }
  0x14   :  { %s16_s27 = sshll.u32 %s1790_s26, 4  ;;  %p1716_p8 = scmp.ne.s32.totalorder %s2163_s0, %s1715_s30  ;;  %s17_s27 = int_to_ptr.vmem [resolvable:$true] %s16_s27 }
  0x15   :  { %p1719_p9 = scmp.lt.u32.totalorder %s1715_s30, %s2163_s0 }
  0x17   :  { %p1721_p10 = pnand %p1719_p9, %p1716_p8 }
  0x19   :  { %1724 = shalt.err (!%p1721_p10)
}
  0x1a   :  { %s1725_s8 = scalar_lea.vmem %s17_s27, 4096  ;;  %p1730_p12 = scmp.lt.s32.totalorder %s17_s27, %s17_s27 }
  0x1b   :  { %p1726_p11 = scmp.ne.s32.totalorder %s17_s27, %s1725_s8  ;;  %p1731_p13 = scmp.lt.s32.totalorder %s1725_s8, %s1725_s8 }
  0x1d   :  { %p1732_p0 = por %p1731_p13, %p1730_p12 }
  0x1f   :  { %p1733_p1 = pnand %p1732_p0, %p1726_p11 }
  0x21   :  { %1736 = shalt.err (!%p1733_p1)
}
  0x22   :  { %s1791_s1 = smov 128   ;;  %s1792_s9 = smov 8  }
  0x23   :  { %22 = dma.hbm_to_vmem [thread:$0]  %s2163_s0, 4096, %s17_s27, [#allocation3], %s1791_s1, %s1791_s1, %s1792_s9  }
  0x24   :  { %s1793_s12 = smov [#allocation7]   ;;  %s1737_s16 = scalar_lea.hbm %s2165_s2, 1024 }
  0x25   :  { %s40_s13 = sshll.u32 %s1793_s12, 4  ;;  %p1738_p2 = scmp.ne.s32.totalorder %s2165_s2, %s1737_s16  ;;  %s41_s13 = int_to_ptr.vmem [resolvable:$true] %s40_s13 }
  0x26   :  { %p1741_p3 = scmp.lt.u32.totalorder %s1737_s16, %s2165_s2 }
  0x28   :  { %p1743_p4 = pnand %p1741_p3, %p1738_p2 }
  0x2a   :  { %1746 = shalt.err (!%p1743_p4)
}
  0x2b   :  { %s1747_s21 = scalar_lea.vmem %s41_s13, 1024  ;;  %p1752_p6 = scmp.lt.s32.totalorder %s41_s13, %s41_s13 }
  0x2c   :  { %p1748_p5 = scmp.ne.s32.totalorder %s41_s13, %s1747_s21  ;;  %p1753_p7 = scmp.lt.s32.totalorder %s1747_s21, %s1747_s21 }
  0x2e   :  { %p1754_p8 = por %p1753_p7, %p1752_p6 }
  0x30   :  { %p1755_p9 = pnand %p1754_p8, %p1748_p5 }
  0x32   :  { %1758 = shalt.err (!%p1755_p9)
}
  0x33   :  { %46 = dma.hbm_to_vmem [thread:$0]  %s2165_s2, 1024, %s41_s13, [#allocation6], %s1788_s22, %s1788_s22, %s1789_s23  }
  0x34   :  { %1781 = dma.done.wait [#allocation3], 4096  }
  0x35   :  { %1782 = vsyncadd [#allocation3], 4294963200 }
  0x36   :  { %1783 = dma.done.wait [#allocation6], 2048  }
  0x37   :  { %1784 = vsyncadd [#allocation6], 4294965248  ;;  %v1397_v0 = vld [vmem:[#allocation5] sm:$0xff]   ;;  %v1398_v1 = vld [vmem:[#allocation5 + $0x8] sm:$0xff]   ;;  %s1794_s2 = smov [#allocation8]  }
  0x38   :  { %1293 = vmatprep.subr.bf16.mxu0 %v1397_v0  ;;  %v1399_v2 = vld [vmem:[#allocation5 + $0x10] sm:$0xff]   ;;  %v1400_v3 = vld [vmem:[#allocation5 + $0x18] sm:$0xff]   ;;  %v1860_v4 = vld [vmem:[#allocation2] sm:$0xff]  ;;  %s1152_s22 = sshll.u32 %s1794_s2, 4  ;;  %s1153_s22 = int_to_ptr.vmem [resolvable:$true] %s1152_s22 }
  0x39   :  { %1294 = vmatpush3.bf16.msra.mxu0 %v1397_v0  ;;  %v1862_v5 = vld [vmem:[#allocation2 + $0x8] sm:$0xff]  ;;  %v1401_v7 = vld [vmem:[#allocation5 + $0x20] sm:$0xff]   ;;  %v1403_v9 = vld [vmem:[#allocation5 + $0x30] sm:$0xff]   ;;  %s1759_s23 = scalar_lea.vmem %s1153_s22, 4096  ;;  %p1764_p11 = scmp.lt.s32.totalorder %s1153_s22, %s1153_s22 }
  0x3a   :  { %1295 = vmatprep.subr.bf16.mxu0 %v1398_v1  ;;  %v89_v6 = vpack.c.bf16 %v1862_v5, %v1860_v4  ;;  %v1402_v8 = vld [vmem:[#allocation5 + $0x28] sm:$0xff]   ;;  %v1404_v10 = vld [vmem:[#allocation5 + $0x38] sm:$0xff]   ;;  %v1866_v11 = vld [vmem:[#allocation2 + $0x10] sm:$0xff]  ;;  %p1760_p10 = scmp.ne.s32.totalorder %s1153_s22, %s1759_s23  ;;  %p1765_p12 = scmp.lt.s32.totalorder %s1759_s23, %s1759_s23 }
  0x3b   :  { %v1868_v12 = vld [vmem:[#allocation2 + $0x18] sm:$0xff]  ;;  %v1870_v13 = vld [vmem:[#allocation2 + $0x20] sm:$0xff]  ;;  %v1872_v14 = vld [vmem:[#allocation2 + $0x28] sm:$0xff] }
  0x3c   :  { %1309 = vmatprep.mubr.bf16.mxu0 %v89_v6  ;;  %v90_v15 = vpack.c.bf16 %v1868_v12, %v1866_v11  ;;  %v91_v16 = vpack.c.bf16 %v1872_v14, %v1870_v13  ;;  %v1878_v17 = vld [vmem:[#allocation2 + $0x30] sm:$0xff]  ;;  %v1880_v18 = vld [vmem:[#allocation2 + $0x38] sm:$0xff]  ;;  %v65_v19 = vld [vmem:[#allocation2 + $0x40] sm:$0xff]  ;;  %p1766_p13 = por %p1765_p12, %p1764_p11 }
  0x3d   :  { %1296 = vmatpush3.bf16.msra.mxu0 %v1398_v1  ;;  %v66_v20 = vld [vmem:[#allocation2 + $0x48] sm:$0xff]  ;;  %v92_v21 = vpack.c.bf16 %v1880_v18, %v1878_v17  ;;  %v67_v23 = vld [vmem:[#allocation2 + $0x50] sm:$0xff]  ;;  %v68_v24 = vld [vmem:[#allocation2 + $0x58] sm:$0xff] }
  0x3e   :  { %1297 = vmatprep.subr.bf16.mxu0 %v1399_v2  ;;  %v93_v22 = vpack.c.bf16 %v66_v20, %v65_v19  ;;  %v69_v25 = vld [vmem:[#allocation2 + $0x60] sm:$0xff]  ;;  %v70_v26 = vld [vmem:[#allocation2 + $0x68] sm:$0xff]  ;;  %v94_v27 = vpack.c.bf16 %v68_v24, %v67_v23  ;;  %v71_v29 = vld [vmem:[#allocation2 + $0x70] sm:$0xff]  ;;  %p1767_p0 = pnand %p1766_p13, %p1760_p10 }
  0x3f   :  { %v95_v28 = vpack.c.bf16 %v70_v26, %v69_v25  ;;  %v72_v30 = vld [vmem:[#allocation2 + $0x78] sm:$0xff]  ;;  %v73_v31 = vld [vmem:[#allocation2 + $0x80] sm:$0xff]  ;;  %v74_v32 = vld [vmem:[#allocation2 + $0x88] sm:$0xff] }
  0x40   :  { %v96_v33 = vpack.c.bf16 %v72_v30, %v71_v29  ;;  %v97_v34 = vpack.c.bf16 %v74_v32, %v73_v31  ;;  %v75_v35 = vld [vmem:[#allocation2 + $0x90] sm:$0xff]  ;;  %v76_v36 = vld [vmem:[#allocation2 + $0x98] sm:$0xff]  ;;  %v77_v37 = vld [vmem:[#allocation2 + $0xa0] sm:$0xff] }
  0x41   :  { %1298 = vmatpush3.bf16.msra.mxu0 %v1399_v2  ;;  %v78_v38 = vld [vmem:[#allocation2 + $0xa8] sm:$0xff]  ;;  %v98_v39 = vpack.c.bf16 %v76_v36, %v75_v35  ;;  %v79_v41 = vld [vmem:[#allocation2 + $0xb0] sm:$0xff]  ;;  %v80_v42 = vld [vmem:[#allocation2 + $0xb8] sm:$0xff] }
  0x42   :  { %1299 = vmatprep.subr.bf16.mxu0 %v1400_v3  ;;  %v99_v40 = vpack.c.bf16 %v78_v38, %v77_v37  ;;  %v81_v43 = vld [vmem:[#allocation2 + $0xc0] sm:$0xff]  ;;  %v82_v44 = vld [vmem:[#allocation2 + $0xc8] sm:$0xff]  ;;  %v100_v45 = vpack.c.bf16 %v80_v42, %v79_v41  ;;  %v83_v47 = vld [vmem:[#allocation2 + $0xd0] sm:$0xff] }
  0x43   :  { %v101_v46 = vpack.c.bf16 %v82_v44, %v81_v43  ;;  %v84_v48 = vld [vmem:[#allocation2 + $0xd8] sm:$0xff]  ;;  %v85_v49 = vld [vmem:[#allocation2 + $0xe0] sm:$0xff]  ;;  %v86_v50 = vld [vmem:[#allocation2 + $0xe8] sm:$0xff] }
  0x44   :  { %v102_v51 = vpack.c.bf16 %v84_v48, %v83_v47  ;;  %v103_v52 = vpack.c.bf16 %v86_v50, %v85_v49  ;;  %v87_v53 = vld [vmem:[#allocation2 + $0xf0] sm:$0xff]  ;;  %v88_v54 = vld [vmem:[#allocation2 + $0xf8] sm:$0xff]  ;;  %v1405_v56 = vld [vmem:[#allocation7] sm:$0xff]  }
  0x45   :  { %1300 = vmatpush3.bf16.msra.mxu0 %v1400_v3  ;;  %v104_v55 = vpack.c.bf16 %v88_v54, %v87_v53  ;;  %1341 = vmatprep.subr.bf16.mxu1 %v1405_v56  ;;  %v1406_v57 = vld [vmem:[#allocation7 + $0x8] sm:$0xff]   ;;  %v1407_v58 = vld [vmem:[#allocation7 + $0x10] sm:$0xff]   ;;  %v1408_v59 = vld [vmem:[#allocation7 + $0x18] sm:$0xff]  }
  0x46   :  { %1301 = vmatprep.subr.bf16.mxu0 %v1401_v7  ;;  %1342 = vmatpush3.bf16.msra.mxu1 %v1405_v56  ;;  %v1409_v60 = vld [vmem:[#allocation7 + $0x20] sm:$0xff]   ;;  %v1410_v61 = vld [vmem:[#allocation7 + $0x28] sm:$0xff]   ;;  %v1411_v62 = vld [vmem:[#allocation7 + $0x30] sm:$0xff]  }
  0x47   :  { %1343 = vmatprep.subr.bf16.mxu1 %v1406_v57  ;;  %v1412_v63 = vld [vmem:[#allocation7 + $0x38] sm:$0xff]  }
  0x49   :  { %1302 = vmatpush3.bf16.msra.mxu0 %v1401_v7 }
  0x4a   :  { %1303 = vmatprep.subr.bf16.mxu0 %v1402_v8  ;;  %1344 = vmatpush3.bf16.msra.mxu1 %v1406_v57 }
  0x4b   :  { %1345 = vmatprep.subr.bf16.mxu1 %v1407_v58 }
  0x4d   :  { %1304 = vmatpush3.bf16.msra.mxu0 %v1402_v8 }
  0x4e   :  { %1305 = vmatprep.subr.bf16.mxu0 %v1403_v9  ;;  %1346 = vmatpush3.bf16.msra.mxu1 %v1407_v58 }
  0x4f   :  { %1347 = vmatprep.subr.bf16.mxu1 %v1408_v59 }
  0x51   :  { %1306 = vmatpush3.bf16.msra.mxu0 %v1403_v9 }
  0x52   :  { %1307 = vmatprep.subr.bf16.mxu0 %v1404_v10  ;;  %1348 = vmatpush3.bf16.msra.mxu1 %v1408_v59 }
  0x53   :  { %1349 = vmatprep.subr.bf16.mxu1 %v1409_v60 }
  0x55   :  { %1308 = vmatpush3.bf16.msra.mxu0 %v1404_v10 }
  0x56   :  { %1350 = vmatpush3.bf16.msra.mxu1 %v1409_v60 }
  0x57   :  { %1351 = vmatprep.subr.bf16.mxu1 %v1410_v61 }
  0x58   :  { %1310 = vmatmul.mubr.bf16.vlgmr.msra.gmra.mrb[0].mxu0 %v90_v15 }
  0x59   :  { %1313 = vmatprep.mubr.bf16.mxu0 %v91_v16 }
  0x5a   :  { %1352 = vmatpush3.bf16.msra.mxu1 %v1410_v61 }
  0x5b   :  { %1353 = vmatprep.subr.bf16.mxu1 %v1411_v62 }
  0x5e   :  { %1354 = vmatpush3.bf16.msra.mxu1 %v1411_v62 }
  0x5f   :  { %1355 = vmatprep.subr.bf16.mxu1 %v1412_v63 }
  0x60   :  { %1314 = vmatmul.mubr.bf16.gmra.mrb[4].mxu0 %v92_v21 }
  0x61   :  { %1317 = vmatprep.mubr.bf16.mxu0 %v93_v22 }
  0x62   :  { %1356 = vmatpush3.bf16.msra.mxu1 %v1412_v63 }
  0x68   :  { %1318 = vmatmul.mubr.bf16.gmra.mrb[8].mxu0 %v94_v27 }
  0x69   :  { %1321 = vmatprep.mubr.bf16.mxu0 %v95_v28 }
  0x70   :  { %1322 = vmatmul.mubr.bf16.gmra.mrb[12].mxu0 %v96_v33 }
  0x71   :  { %1325 = vmatprep.mubr.bf16.mxu0 %v97_v34 }
  0x78   :  { %1326 = vmatmul.mubr.bf16.gmra.mrb[16].mxu0 %v98_v39 }
  0x79   :  { %1329 = vmatprep.mubr.bf16.mxu0 %v99_v40 }
  0x80   :  { %1330 = vmatmul.mubr.bf16.gmra.mrb[20].mxu0 %v100_v45 }
  0x81   :  { %1333 = vmatprep.mubr.bf16.mxu0 %v101_v46 }
  0x88   :  { %1334 = vmatmul.mubr.bf16.gmra.mrb[24].mxu0 %v102_v51 }
  0x89   :  { %1337 = vmatprep.mubr.bf16.mxu0 %v103_v52 }
  0x90   :  { %1338 = vmatmul.mubr.bf16.gmra.mrb[28].mxu0 %v104_v55 }
 0x12b   :  { %v1884_v0 = vpop.f32.mrb[0].mxu0 }
 0x12c   :  { %v1175_v1 = vmul.f32 -1.442695, %v1884_v0  ;;  %v1887_v2 = vpop.f32.mrb[1].mxu0 }
 0x12d   :  { %v1173_v3 = vmul.f32 -1.442695, %v1887_v2  ;;  %v1890_v6 = vpop.f32.mrb[2].mxu0 }
 0x12e   :  { %1413 = vpow2.f32 %v1175_v1  ;;  %v1176_v7 = vmul.f32 -1.442695, %v1890_v6  ;;  %v1893_v8 = vpop.f32.mrb[3].mxu0 }
 0x12f   :  { %1415 = vpow2.f32 %v1173_v3  ;;  %v1174_v9 = vmul.f32 -1.442695, %v1893_v8 }
 0x130   :  { %1417 = vpow2.f32 %v1176_v7 }
 0x131   :  { %1419 = vpow2.f32 %v1174_v9 }
 0x133   :  { %v1896_v10 = vpop.f32.mrb[4].mxu0 }
 0x134   :  { %v1179_v15 = vmul.f32 -1.442695, %v1896_v10  ;;  %v1899_v16 = vpop.f32.mrb[5].mxu0 }
 0x135   :  { %v1177_v19 = vmul.f32 -1.442695, %v1899_v16  ;;  %v1902_v20 = vpop.f32.mrb[6].mxu0 }
 0x136   :  { %1421 = vpow2.f32 %v1179_v15  ;;  %v1180_v21 = vmul.f32 -1.442695, %v1902_v20  ;;  %v1905_v22 = vpop.f32.mrb[7].mxu0 }
 0x137   :  { %1423 = vpow2.f32 %v1177_v19  ;;  %v1178_v23 = vmul.f32 -1.442695, %v1905_v22 }
 0x138   :  { %v1414_v24 = vpop.eup %1413  ;;  %1425 = vpow2.f32 %v1180_v21 }
 0x139   :  { %v1416_v25 = vpop.eup %1415  ;;  %v428_v26 = vadd.f32 1.0, %v1414_v24  ;;  %1427 = vpow2.f32 %v1178_v23 }
 0x13a   :  { %v1418_v27 = vpop.eup %1417  ;;  %v426_v28 = vadd.f32 1.0, %v1416_v25 }
 0x13b   :  { %v1420_v29 = vpop.eup %1419  ;;  %1429 = vrcp.f32 %v428_v26  ;;  %v429_v30 = vadd.f32 1.0, %v1418_v27  ;;  %v1908_v31 = vpop.f32.mrb[8].mxu0 }
 0x13c   :  { %1431 = vrcp.f32 %v426_v28  ;;  %v427_v32 = vadd.f32 1.0, %v1420_v29  ;;  %v1183_v33 = vmul.f32 -1.442695, %v1908_v31  ;;  %v1911_v34 = vpop.f32.mrb[9].mxu0 }
 0x13d   :  { %1433 = vrcp.f32 %v429_v30  ;;  %v1181_v35 = vmul.f32 -1.442695, %v1911_v34  ;;  %v1914_v36 = vpop.f32.mrb[10].mxu0 }
 0x13e   :  { %1435 = vrcp.f32 %v427_v32  ;;  %v1184_v37 = vmul.f32 -1.442695, %v1914_v36  ;;  %v1917_v38 = vpop.f32.mrb[11].mxu0 }
 0x13f   :  { %1437 = vpow2.f32 %v1183_v33  ;;  %v1182_v39 = vmul.f32 -1.442695, %v1917_v38 }
 0x140   :  { %v1422_v40 = vpop.eup %1421  ;;  %1439 = vpow2.f32 %v1181_v35 }
 0x141   :  { %v1424_v41 = vpop.eup %1423  ;;  %v432_v42 = vadd.f32 1.0, %v1422_v40  ;;  %1441 = vpow2.f32 %v1184_v37 }
 0x142   :  { %v1426_v43 = vpop.eup %1425  ;;  %v430_v44 = vadd.f32 1.0, %v1424_v41  ;;  %1443 = vpow2.f32 %v1182_v39 }
 0x143   :  { %v1428_v45 = vpop.eup %1427  ;;  %1445 = vrcp.f32 %v432_v42  ;;  %v433_v46 = vadd.f32 1.0, %v1426_v43  ;;  %v1920_v47 = vpop.f32.mrb[12].mxu0 }
 0x144   :  { %1447 = vrcp.f32 %v430_v44  ;;  %v431_v48 = vadd.f32 1.0, %v1428_v45  ;;  %v1187_v49 = vmul.f32 -1.442695, %v1920_v47  ;;  %v1923_v50 = vpop.f32.mrb[13].mxu0 }
 0x145   :  { %v1430_v51 = vpop.eup %1429  ;;  %1449 = vrcp.f32 %v433_v46  ;;  %v1185_v52 = vmul.f32 -1.442695, %v1923_v50  ;;  %v1926_v53 = vpop.f32.mrb[14].mxu0 }
 0x146   :  { %v1432_v54 = vpop.eup %1431  ;;  %1451 = vrcp.f32 %v431_v48  ;;  %v1188_v55 = vmul.f32 -1.442695, %v1926_v53  ;;  %v1929_v56 = vpop.f32.mrb[15].mxu0  ;;  %v524_v60 = vmul.f32 %v1430_v51, %v1884_v0 }
 0x147   :  { %v1434_v57 = vpop.eup %1433  ;;  %1453 = vpow2.f32 %v1187_v49  ;;  %v1186_v58 = vmul.f32 -1.442695, %v1929_v56  ;;  %v522_v63 = vmul.f32 %v1432_v54, %v1887_v2 }
 0x148   :  { %v1436_v59 = vpop.eup %1435  ;;  %v525_v61 = vmul.f32 %v1434_v57, %v1890_v6  ;;  %1455 = vpow2.f32 %v1185_v52 }
 0x149   :  { %v1438_v62 = vpop.eup %1437  ;;  %v523_v1 = vmul.f32 %v1436_v59, %v1893_v8  ;;  %1457 = vpow2.f32 %v1188_v55 }
 0x14a   :  { %v1440_v3 = vpop.eup %1439  ;;  %v555_v7 = vpack.c.bf16 %v525_v61, %v524_v60  ;;  %v436_v9 = vadd.f32 1.0, %v1438_v62  ;;  %1459 = vpow2.f32 %v1186_v58 }
 0x14b   :  { %v1442_v15 = vpop.eup %1441  ;;  %v434_v19 = vadd.f32 1.0, %v1440_v3  ;;  %v1936_v21 = vpop.f32.mrb[16].mxu0  ;;  %v554_v23 = vpack.c.bf16 %v523_v1, %v522_v63 }
 0x14c   :  { %v1444_v24 = vpop.eup %1443  ;;  %1461 = vrcp.f32 %v436_v9  ;;  %v437_v0 = vadd.f32 1.0, %v1442_v15  ;;  %v1191_v6 = vmul.f32 -1.442695, %v1936_v21  ;;  %v1939_v25 = vpop.f32.mrb[17].mxu0 }
 0x14d   :  { %v1446_v2 = vpop.eup %1445  ;;  %1463 = vrcp.f32 %v434_v19  ;;  %v435_v8 = vadd.f32 1.0, %v1444_v24  ;;  %v1189_v26 = vmul.f32 -1.442695, %v1939_v25  ;;  %v1942_v27 = vpop.f32.mrb[18].mxu0  ;;  %1357 = vmatprep.mubr.bf16.mxu1 %v554_v23 }
 0x14e   :  { %v1448_v28 = vpop.eup %1447  ;;  %1465 = vrcp.f32 %v437_v0  ;;  %v1192_v29 = vmul.f32 -1.442695, %v1942_v27  ;;  %v1945_v30 = vpop.f32.mrb[19].mxu0  ;;  %1358 = vmatmul.mubr.bf16.vlgmr.msra.gmra.mrb[0].mxu1 %v555_v7  ;;  %v528_v37 = vmul.f32 %v1446_v2, %v1896_v10 }
 0x14f   :  { %v1450_v32 = vpop.eup %1449  ;;  %1467 = vrcp.f32 %v435_v8  ;;  %v1190_v33 = vmul.f32 -1.442695, %v1945_v30  ;;  %v526_v41 = vmul.f32 %v1448_v28, %v1899_v16 }
 0x150   :  { %v1452_v35 = vpop.eup %1451  ;;  %v529_v39 = vmul.f32 %v1450_v32, %v1902_v20  ;;  %1469 = vpow2.f32 %v1191_v6 }
 0x151   :  { %v1454_v40 = vpop.eup %1453  ;;  %v527_v42 = vmul.f32 %v1452_v35, %v1905_v22  ;;  %1471 = vpow2.f32 %v1189_v26 }
 0x152   :  { %v1456_v43 = vpop.eup %1455  ;;  %v557_v44 = vpack.c.bf16 %v529_v39, %v528_v37  ;;  %v440_v45 = vadd.f32 1.0, %v1454_v40  ;;  %1473 = vpow2.f32 %v1192_v29 }
 0x153   :  { %v1458_v46 = vpop.eup %1457  ;;  %v556_v48 = vpack.c.bf16 %v527_v42, %v526_v41  ;;  %v438_v49 = vadd.f32 1.0, %v1456_v43  ;;  %1475 = vpow2.f32 %v1190_v33  ;;  %v1952_v51 = vpop.f32.mrb[20].mxu0 }
 0x154   :  { %v1460_v10 = vpop.eup %1459  ;;  %1477 = vrcp.f32 %v440_v45  ;;  %v441_v20 = vadd.f32 1.0, %v1458_v46  ;;  %v1195_v52 = vmul.f32 -1.442695, %v1952_v51  ;;  %v1955_v54 = vpop.f32.mrb[21].mxu0 }
 0x155   :  { %1479 = vrcp.f32 %v438_v49  ;;  %v439_v16 = vadd.f32 1.0, %v1460_v10  ;;  %v1193_v22 = vmul.f32 -1.442695, %v1955_v54  ;;  %v1958_v55 = vpop.f32.mrb[22].mxu0  ;;  %1361 = vmatprep.mubr.bf16.mxu1 %v556_v48 }
 0x156   :  { %v1462_v57 = vpop.eup %1461  ;;  %1481 = vrcp.f32 %v441_v20  ;;  %v1196_v58 = vmul.f32 -1.442695, %v1958_v55  ;;  %v1961_v59 = vpop.f32.mrb[23].mxu0  ;;  %1362 = vmatmul.mubr.bf16.gmra.mrb[4].mxu1 %v557_v44 }
 0x157   :  { %v1464_v60 = vpop.eup %1463  ;;  %1483 = vrcp.f32 %v439_v16  ;;  %v1194_v61 = vmul.f32 -1.442695, %v1961_v59  ;;  %v532_v1 = vmul.f32 %v1462_v57, %v1908_v31 }
 0x158   :  { %v1466_v62 = vpop.eup %1465  ;;  %1485 = vpow2.f32 %v1195_v52  ;;  %v530_v9 = vmul.f32 %v1464_v60, %v1911_v34 }
 0x159   :  { %v1468_v63 = vpop.eup %1467  ;;  %v533_v3 = vmul.f32 %v1466_v62, %v1914_v36  ;;  %1487 = vpow2.f32 %v1193_v22 }
 0x15a   :  { %v1470_v7 = vpop.eup %1469  ;;  %v531_v15 = vmul.f32 %v1468_v63, %v1917_v38  ;;  %1489 = vpow2.f32 %v1196_v58 }
 0x15b   :  { %v1472_v19 = vpop.eup %1471  ;;  %v559_v23 = vpack.c.bf16 %v533_v3, %v532_v1  ;;  %v444_v24 = vadd.f32 1.0, %v1470_v7  ;;  %1491 = vpow2.f32 %v1194_v61  ;;  %v1968_v0 = vpop.f32.mrb[24].mxu0 }
 0x15c   :  { %v1474_v6 = vpop.eup %1473  ;;  %v558_v2 = vpack.c.bf16 %v531_v15, %v530_v9  ;;  %v442_v8 = vadd.f32 1.0, %v1472_v19  ;;  %v1970_v26 = vpop.f32.mrb[25].mxu0  ;;  %v1199_v28 = vmul.f32 -1.442695, %v1968_v0 }
 0x15d   :  { %v1476_v31 = vpop.eup %1475  ;;  %1493 = vrcp.f32 %v444_v24  ;;  %v445_v36 = vadd.f32 1.0, %v1474_v6  ;;  %v1973_v34 = vpop.f32.mrb[26].mxu0  ;;  %v1197_v32 = vmul.f32 -1.442695, %v1970_v26 }
 0x15e   :  { %v1478_v38 = vpop.eup %1477  ;;  %1495 = vrcp.f32 %v442_v8  ;;  %v443_v29 = vadd.f32 1.0, %v1476_v31  ;;  %1365 = vmatprep.mubr.bf16.mxu1 %v558_v2  ;;  %v1976_v33 = vpop.f32.mrb[27].mxu0  ;;  %v1200_v37 = vmul.f32 -1.442695, %v1973_v34 }
 0x15f   :  { %v1480_v35 = vpop.eup %1479  ;;  %1497 = vrcp.f32 %v445_v36  ;;  %1366 = vmatmul.mubr.bf16.gmra.mrb[8].mxu1 %v559_v23  ;;  %v1198_v40 = vmul.f32 -1.442695, %v1976_v33  ;;  %v536_v42 = vmul.f32 %v1478_v38, %v1920_v47 }
 0x160   :  { %v1482_v39 = vpop.eup %1481  ;;  %1499 = vrcp.f32 %v443_v29  ;;  %v534_v45 = vmul.f32 %v1480_v35, %v1923_v50 }
 0x161   :  { %v1484_v41 = vpop.eup %1483  ;;  %v537_v43 = vmul.f32 %v1482_v39, %v1926_v53  ;;  %1501 = vpow2.f32 %v1199_v28 }
 0x162   :  { %v1486_v44 = vpop.eup %1485  ;;  %v535_v46 = vmul.f32 %v1484_v41, %v1929_v56  ;;  %1503 = vpow2.f32 %v1197_v32 }
 0x163   :  { %v1488_v48 = vpop.eup %1487  ;;  %v561_v49 = vpack.c.bf16 %v537_v43, %v536_v42  ;;  %v448_v10 = vadd.f32 1.0, %v1486_v44  ;;  %1505 = vpow2.f32 %v1200_v37  ;;  %v1984_v20 = vpop.f32.mrb[28].mxu0 }
 0x164   :  { %v1490_v52 = vpop.eup %1489  ;;  %v560_v16 = vpack.c.bf16 %v535_v46, %v534_v45  ;;  %v446_v22 = vadd.f32 1.0, %v1488_v48  ;;  %1507 = vpow2.f32 %v1198_v40  ;;  %v1986_v47 = vpop.f32.mrb[29].mxu0  ;;  %v1203_v50 = vmul.f32 -1.442695, %v1984_v20 }
 0x165   :  { %v1492_v53 = vpop.eup %1491  ;;  %1509 = vrcp.f32 %v448_v10  ;;  %v449_v57 = vadd.f32 1.0, %v1490_v52  ;;  %v1989_v58 = vpop.f32.mrb[30].mxu0  ;;  %v1201_v60 = vmul.f32 -1.442695, %v1986_v47 }
 0x166   :  { %1511 = vrcp.f32 %v446_v22  ;;  %v447_v56 = vadd.f32 1.0, %v1492_v53  ;;  %1369 = vmatprep.mubr.bf16.mxu1 %v560_v16  ;;  %v1992_v61 = vpop.f32.mrb[31].mxu0  ;;  %v1204_v63 = vmul.f32 -1.442695, %v1989_v58 }
 0x167   :  { %v1494_v62 = vpop.eup %1493  ;;  %1513 = vrcp.f32 %v449_v57  ;;  %1370 = vmatmul.mubr.bf16.gmra.mrb[12].mxu1 %v561_v49  ;;  %v1202_v3 = vmul.f32 -1.442695, %v1992_v61 }
 0x168   :  { %v1496_v1 = vpop.eup %1495  ;;  %1515 = vrcp.f32 %v447_v56  ;;  %v540_v15 = vmul.f32 %v1494_v62, %v1936_v21 }
 0x169   :  { %v1498_v7 = vpop.eup %1497  ;;  %1517 = vpow2.f32 %v1203_v50  ;;  %v538_v24 = vmul.f32 %v1496_v1, %v1939_v25 }
 0x16a   :  { %v1500_v9 = vpop.eup %1499  ;;  %v541_v19 = vmul.f32 %v1498_v7, %v1942_v27  ;;  %1519 = vpow2.f32 %v1201_v60 }
 0x16b   :  { %v1502_v23 = vpop.eup %1501  ;;  %v539_v6 = vmul.f32 %v1500_v9, %v1945_v30  ;;  %1521 = vpow2.f32 %v1204_v63 }
 0x16c   :  { %v1504_v2 = vpop.eup %1503  ;;  %v563_v8 = vpack.c.bf16 %v541_v19, %v540_v15  ;;  %v452_v31 = vadd.f32 1.0, %v1502_v23  ;;  %1523 = vpow2.f32 %v1202_v3 }
 0x16d   :  { %v1506_v36 = vpop.eup %1505  ;;  %v562_v28 = vpack.c.bf16 %v539_v6, %v538_v24  ;;  %v450_v38 = vadd.f32 1.0, %v1504_v2 }
 0x16e   :  { %v1508_v29 = vpop.eup %1507  ;;  %1525 = vrcp.f32 %v452_v31  ;;  %v453_v32 = vadd.f32 1.0, %v1506_v36 }
 0x16f   :  { %v1510_v21 = vpop.eup %1509  ;;  %1527 = vrcp.f32 %v450_v38  ;;  %v451_v27 = vadd.f32 1.0, %v1508_v29  ;;  %1373 = vmatprep.mubr.bf16.mxu1 %v562_v28 }
 0x170   :  { %v1512_v35 = vpop.eup %1511  ;;  %1529 = vrcp.f32 %v453_v32  ;;  %1374 = vmatmul.mubr.bf16.gmra.mrb[16].mxu1 %v563_v8  ;;  %v544_v37 = vmul.f32 %v1510_v21, %v1952_v51 }
 0x171   :  { %v1514_v25 = vpop.eup %1513  ;;  %1531 = vrcp.f32 %v451_v27  ;;  %v542_v41 = vmul.f32 %v1512_v35, %v1955_v54 }
 0x172   :  { %v1516_v30 = vpop.eup %1515  ;;  %v545_v39 = vmul.f32 %v1514_v25, %v1958_v55 }
 0x173   :  { %v1518_v40 = vpop.eup %1517  ;;  %v543_v42 = vmul.f32 %v1516_v30, %v1961_v59 }
 0x174   :  { %v1520_v43 = vpop.eup %1519  ;;  %v565_v44 = vpack.c.bf16 %v545_v39, %v544_v37  ;;  %v456_v45 = vadd.f32 1.0, %v1518_v40 }
 0x175   :  { %v1522_v46 = vpop.eup %1521  ;;  %v564_v48 = vpack.c.bf16 %v543_v42, %v542_v41  ;;  %v454_v49 = vadd.f32 1.0, %v1520_v43 }
 0x176   :  { %v1524_v10 = vpop.eup %1523  ;;  %1533 = vrcp.f32 %v456_v45  ;;  %v457_v52 = vadd.f32 1.0, %v1522_v46 }
 0x177   :  { %1535 = vrcp.f32 %v454_v49  ;;  %v455_v16 = vadd.f32 1.0, %v1524_v10  ;;  %1377 = vmatprep.mubr.bf16.mxu1 %v564_v48 }
 0x178   :  { %v1526_v51 = vpop.eup %1525  ;;  %1537 = vrcp.f32 %v457_v52  ;;  %1378 = vmatmul.mubr.bf16.gmra.mrb[20].mxu1 %v565_v44 }
 0x179   :  { %v1528_v55 = vpop.eup %1527  ;;  %1539 = vrcp.f32 %v455_v16  ;;  %v548_v59 = vmul.f32 %v1526_v51, %v1968_v0 }
 0x17a   :  { %v1530_v54 = vpop.eup %1529  ;;  %v546_v57 = vmul.f32 %v1528_v55, %v1970_v26 }
 0x17b   :  { %v1532_v22 = vpop.eup %1531  ;;  %v549_v53 = vmul.f32 %v1530_v54, %v1973_v34 }
 0x17c   :  { %v547_v50 = vmul.f32 %v1532_v22, %v1976_v33 }
 0x17d   :  { %v567_v56 = vpack.c.bf16 %v549_v53, %v548_v59 }
 0x17e   :  { %v566_v60 = vpack.c.bf16 %v547_v50, %v546_v57  ;;  %v1019_v57 = vmul.f32 0.70710677, %v1860_v4 }
 0x180   :  { %v1534_v62 = vpop.eup %1533  ;;  %1381 = vmatprep.mubr.bf16.mxu1 %v566_v60 }
 0x181   :  { %v1536_v63 = vpop.eup %1535  ;;  %1382 = vmatmul.mubr.bf16.gmra.mrb[24].mxu1 %v567_v56  ;;  %v552_v7 = vmul.f32 %v1534_v62, %v1984_v20  ;;  %v1021_v62 = vmul.f32 0.70710677, %v1866_v11 }
 0x182   :  { %v1538_v1 = vpop.eup %1537  ;;  %v550_v0 = vmul.f32 %v1536_v63, %v1986_v47 }
 0x183   :  { %v1540_v3 = vpop.eup %1539  ;;  %v553_v9 = vmul.f32 %v1538_v1, %v1989_v58 }
 0x184   :  { %v551_v34 = vmul.f32 %v1540_v3, %v1992_v61 }
 0x185   :  { %v569_v15 = vpack.c.bf16 %v553_v9, %v552_v7  ;;  %v1022_v9 = vmul.f32 0.70710677, %v1868_v12 }
 0x186   :  { %v568_v26 = vpack.c.bf16 %v551_v34, %v550_v0 }
 0x188   :  { %1385 = vmatprep.mubr.bf16.mxu1 %v568_v26 }
 0x189   :  { %1386 = vmatmul.mubr.bf16.gmra.mrb[28].mxu1 %v569_v15 }
 0x221   :  { %v2012_v33 = vpop.f32.mrb[0].mxu1 }
 0x222   :  { %v1215_v19 = vmul.f32 -1.442695, %v2012_v33  ;;  %v2015_v23 = vpop.f32.mrb[1].mxu1 }
 0x223   :  { %v1213_v24 = vmul.f32 -1.442695, %v2015_v23  ;;  %v2018_v6 = vpop.f32.mrb[2].mxu1 }
 0x224   :  { %1541 = vpow2.f32 %v1215_v19  ;;  %v1216_v20 = vmul.f32 -1.442695, %v2018_v6  ;;  %v2021_v47 = vpop.f32.mrb[3].mxu1 }
 0x225   :  { %1543 = vpow2.f32 %v1213_v24  ;;  %v1214_v58 = vmul.f32 -1.442695, %v2021_v47  ;;  %v1020_v24 = vmul.f32 0.70710677, %v1862_v5 }
 0x226   :  { %1545 = vpow2.f32 %v1216_v20 }
 0x227   :  { %1547 = vpow2.f32 %v1214_v58 }
 0x229   :  { %v2024_v61 = vpop.f32.mrb[4].mxu1 }
 0x22a   :  { %v1219_v2 = vmul.f32 -1.442695, %v2024_v61  ;;  %v2027_v8 = vpop.f32.mrb[5].mxu1 }
 0x22b   :  { %v1217_v31 = vmul.f32 -1.442695, %v2027_v8  ;;  %v2030_v36 = vpop.f32.mrb[6].mxu1 }
 0x22c   :  { %1549 = vpow2.f32 %v1219_v2  ;;  %v1220_v28 = vmul.f32 -1.442695, %v2030_v36  ;;  %v2033_v38 = vpop.f32.mrb[7].mxu1 }
 0x22d   :  { %1551 = vpow2.f32 %v1217_v31  ;;  %v1218_v29 = vmul.f32 -1.442695, %v2033_v38 }
 0x22e   :  { %v1542_v32 = vpop.eup %1541  ;;  %1553 = vpow2.f32 %v1220_v28 }
 0x22f   :  { %v1544_v21 = vpop.eup %1543  ;;  %v893_v27 = vadd.f32 1.0, %v1542_v32  ;;  %1555 = vpow2.f32 %v1218_v29 }
 0x230   :  { %v1546_v35 = vpop.eup %1545  ;;  %v891_v25 = vadd.f32 1.0, %v1544_v21 }
 0x231   :  { %v1548_v30 = vpop.eup %1547  ;;  %1557 = vrcp.f32 %v893_v27  ;;  %v894_v37 = vadd.f32 1.0, %v1546_v35  ;;  %v1023_v27 = vmul.f32 0.70710677, %v1870_v13 }
 0x232   :  { %1559 = vrcp.f32 %v891_v25  ;;  %v892_v39 = vadd.f32 1.0, %v1548_v30  ;;  %v2036_v40 = vpop.f32.mrb[8].mxu1 }
 0x233   :  { %1561 = vrcp.f32 %v894_v37  ;;  %v1223_v41 = vmul.f32 -1.442695, %v2036_v40  ;;  %v2039_v42 = vpop.f32.mrb[9].mxu1 }
 0x234   :  { %1563 = vrcp.f32 %v892_v39  ;;  %v1221_v43 = vmul.f32 -1.442695, %v2039_v42  ;;  %v2042_v44 = vpop.f32.mrb[10].mxu1 }
 0x235   :  { %1565 = vpow2.f32 %v1223_v41  ;;  %v1224_v45 = vmul.f32 -1.442695, %v2042_v44  ;;  %v2045_v46 = vpop.f32.mrb[11].mxu1 }
 0x236   :  { %v1550_v48 = vpop.eup %1549  ;;  %1567 = vpow2.f32 %v1221_v43  ;;  %v1222_v49 = vmul.f32 -1.442695, %v2045_v46  ;;  %v1025_v43 = vmul.f32 0.70710677, %v1878_v17 }
 0x237   :  { %v1552_v10 = vpop.eup %1551  ;;  %v897_v52 = vadd.f32 1.0, %v1550_v48  ;;  %1569 = vpow2.f32 %v1224_v45 }
 0x238   :  { %v1554_v16 = vpop.eup %1553  ;;  %v895_v51 = vadd.f32 1.0, %v1552_v10  ;;  %1571 = vpow2.f32 %v1222_v49 }
 0x239   :  { %v1556_v55 = vpop.eup %1555  ;;  %1573 = vrcp.f32 %v897_v52  ;;  %v898_v54 = vadd.f32 1.0, %v1554_v16 }
 0x23a   :  { %1575 = vrcp.f32 %v895_v51  ;;  %v896_v22 = vadd.f32 1.0, %v1556_v55  ;;  %v2048_v59 = vpop.f32.mrb[12].mxu1 }
 0x23b   :  { %v1558_v53 = vpop.eup %1557  ;;  %1577 = vrcp.f32 %v898_v54  ;;  %v1227_v50 = vmul.f32 -1.442695, %v2048_v59  ;;  %v2052_v56 = vpop.f32.mrb[13].mxu1 }
 0x23c   :  { %v1560_v60 = vpop.eup %1559  ;;  %v989_v63 = vmul.f32 %v1558_v53, %v2012_v33  ;;  %1579 = vrcp.f32 %v896_v22  ;;  %v1225_v1 = vmul.f32 -1.442695, %v2052_v56  ;;  %v2057_v3 = vpop.f32.mrb[14].mxu1 }
 0x23d   :  { %v1562_v7 = vpop.eup %1561  ;;  %v987_v4 = vmul.f32 %v1560_v60, %v2015_v23  ;;  %1581 = vpow2.f32 %v1227_v50  ;;  %v1228_v0 = vmul.f32 -1.442695, %v2057_v3  ;;  %v2062_v34 = vpop.f32.mrb[15].mxu1 }
 0x23e   :  { %v1564_v15 = vpop.eup %1563  ;;  %v1053_v26 = vmul.f32 1.1785113, %v989_v63  ;;  %v990_v11 = vmul.f32 %v1562_v7, %v2018_v6  ;;  %1583 = vpow2.f32 %v1225_v1  ;;  %v1226_v33 = vmul.f32 -1.442695, %v2062_v34 }
 0x23f   :  { %v1566_v19 = vpop.eup %1565  ;;  %v1051_v20 = vmul.f32 1.1785113, %v987_v4  ;;  %v988_v12 = vmul.f32 %v1564_v15, %v2021_v47  ;;  %1585 = vpow2.f32 %v1228_v0  ;;  %v1024_v47 = vmul.f32 0.70710677, %v1872_v14 }
 0x240   :  { %v1568_v23 = vpop.eup %1567  ;;  %v1085_v58 = vadd.f32 %v1053_v26, %v1021_v62  ;;  %v1054_v2 = vmul.f32 1.1785113, %v990_v11  ;;  %v901_v31 = vadd.f32 1.0, %v1566_v19  ;;  %1587 = vpow2.f32 %v1226_v33  ;;  %v1669_v33 = vld [vmem:[#allocation2 + $0x40] sm:$0xff] }
 0x241   :  { %v1570_v28 = vpop.eup %1569  ;;  %v1083_v29 = vadd.f32 %v1051_v20, %v1019_v57  ;;  %v1052_v32 = vmul.f32 1.1785113, %v988_v12  ;;  %v899_v21 = vadd.f32 1.0, %v1568_v23  ;;  %v1026_v14 = vmul.f32 0.70710677, %v1880_v18  ;;  %v1670_v23 = vld [vmem:[#allocation2 + $0x50] sm:$0xff] }
 0x242   :  { %v1572_v6 = vpop.eup %1571  ;;  %1117 = vst [vmem:[#allocation8 + $0x10] sm:$0xff] %v1085_v58  ;;  %v1086_v35 = vadd.f32 %v1054_v2, %v1022_v9  ;;  %1589 = vrcp.f32 %v901_v31  ;;  %v902_v5 = vadd.f32 1.0, %v1570_v28  ;;  %v1027_v19 = vmul.f32 0.70710677, %v1669_v33 }
 0x243   :  { %v1574_v25 = vpop.eup %1573  ;;  %1115 = vst [vmem:[#allocation8] sm:$0xff] %v1083_v29  ;;  %v1084_v30 = vadd.f32 %v1052_v32, %v1020_v24  ;;  %1591 = vrcp.f32 %v899_v21  ;;  %v900_v37 = vadd.f32 1.0, %v1572_v6  ;;  %v2070_v39 = vpop.f32.mrb[16].mxu1  ;;  %v1029_v58 = vmul.f32 0.70710677, %v1670_v23  ;;  %v1671_v32 = vld [vmem:[#allocation2 + $0x58] sm:$0xff] }
 0x244   :  { %v1576_v41 = vpop.eup %1575  ;;  %1118 = vst [vmem:[#allocation8 + $0x18] sm:$0xff] %v1086_v35  ;;  %v993_v45 = vmul.f32 %v1574_v25, %v2024_v61  ;;  %1593 = vrcp.f32 %v902_v5  ;;  %v1231_v13 = vmul.f32 -1.442695, %v2070_v39  ;;  %v2075_v48 = vpop.f32.mrb[17].mxu1  ;;  %v1030_v21 = vmul.f32 0.70710677, %v1671_v32 }
 0x245   :  { %v1578_v49 = vpop.eup %1577  ;;  %1116 = vst [vmem:[#allocation8 + $0x8] sm:$0xff] %v1084_v30  ;;  %v991_v10 = vmul.f32 %v1576_v41, %v2027_v8  ;;  %1595 = vrcp.f32 %v900_v37  ;;  %v1229_v52 = vmul.f32 -1.442695, %v2075_v48  ;;  %v2080_v16 = vpop.f32.mrb[18].mxu1  ;;  %v1672_v37 = vld [vmem:[#allocation2 + $0x48] sm:$0xff] }
 0x246   :  { %v1580_v17 = vpop.eup %1579  ;;  %v1057_v51 = vmul.f32 1.1785113, %v993_v45  ;;  %v994_v61 = vmul.f32 %v1578_v49, %v2030_v36  ;;  %1597 = vpow2.f32 %v1231_v13  ;;  %v1232_v55 = vmul.f32 -1.442695, %v2080_v16  ;;  %v2084_v54 = vpop.f32.mrb[19].mxu1 }
 0x247   :  { %v1582_v22 = vpop.eup %1581  ;;  %v1055_v53 = vmul.f32 1.1785113, %v991_v10  ;;  %v992_v18 = vmul.f32 %v1580_v17, %v2033_v38  ;;  %1599 = vpow2.f32 %v1229_v52  ;;  %v1230_v8 = vmul.f32 -1.442695, %v2084_v54 }
 0x248   :  { %v1584_v57 = vpop.eup %1583  ;;  %v1089_v50 = vadd.f32 %v1057_v51, %v1025_v43  ;;  %v1058_v60 = vmul.f32 1.1785113, %v994_v61  ;;  %v905_v62 = vadd.f32 1.0, %v1582_v22  ;;  %1601 = vpow2.f32 %v1232_v55  ;;  %v1673_v61 = vld [vmem:[#allocation2 + $0x60] sm:$0xff] }
 0x249   :  { %v1586_v63 = vpop.eup %1585  ;;  %v1087_v1 = vadd.f32 %v1055_v53, %v1023_v27  ;;  %v1056_v36 = vmul.f32 1.1785113, %v992_v18  ;;  %v903_v7 = vadd.f32 1.0, %v1584_v57  ;;  %1603 = vpow2.f32 %v1230_v8  ;;  %v1674_v8 = vld [vmem:[#allocation2 + $0x68] sm:$0xff] }
 0x24a   :  { %v1588_v9 = vpop.eup %1587  ;;  %1121 = vst [vmem:[#allocation8 + $0x30] sm:$0xff] %v1089_v50  ;;  %v1090_v4 = vadd.f32 %v1058_v60, %v1026_v14  ;;  %1605 = vrcp.f32 %v905_v62  ;;  %v906_v0 = vadd.f32 1.0, %v1586_v63  ;;  %v1028_v41 = vmul.f32 0.70710677, %v1672_v37  ;;  %v1675_v63 = vld [vmem:[#allocation2 + $0x70] sm:$0xff] }
 0x24b   :  { %1119 = vst [vmem:[#allocation8 + $0x20] sm:$0xff] %v1087_v1  ;;  %v1088_v38 = vadd.f32 %v1056_v36, %v1024_v47  ;;  %1607 = vrcp.f32 %v903_v7  ;;  %v904_v15 = vadd.f32 1.0, %v1588_v9  ;;  %v2088_v26 = vpop.f32.mrb[20].mxu1  ;;  %v1031_v55 = vmul.f32 0.70710677, %v1673_v61 }
 0x24c   :  { %v1590_v11 = vpop.eup %1589  ;;  %1122 = vst [vmem:[#allocation8 + $0x38] sm:$0xff] %v1090_v4  ;;  %1609 = vrcp.f32 %v906_v0  ;;  %v1235_v24 = vmul.f32 -1.442695, %v2088_v26  ;;  %v2091_v20 = vpop.f32.mrb[21].mxu1  ;;  %v1033_v1 = vmul.f32 0.70710677, %v1675_v63 }
 0x24d   :  { %v1592_v12 = vpop.eup %1591  ;;  %1120 = vst [vmem:[#allocation8 + $0x28] sm:$0xff] %v1088_v38  ;;  %v997_v2 = vmul.f32 %v1590_v11, %v2036_v40  ;;  %1611 = vrcp.f32 %v904_v15  ;;  %v1233_v31 = vmul.f32 -1.442695, %v2091_v20  ;;  %v2095_v28 = vpop.f32.mrb[22].mxu1  ;;  %v1676_v0 = vld [vmem:[#allocation2 + $0x78] sm:$0xff]  ;;  %v1680_v63 = vld [vmem:[#allocation2 + $0x88] sm:$0xff] }
 0x24e   :  { %v1594_v29 = vpop.eup %1593  ;;  %v995_v6 = vmul.f32 %v1592_v12, %v2039_v42  ;;  %1613 = vpow2.f32 %v1235_v24  ;;  %v1236_v27 = vmul.f32 -1.442695, %v2095_v28  ;;  %v2099_v35 = vpop.f32.mrb[23].mxu1  ;;  %v1034_v38 = vmul.f32 0.70710677, %v1676_v0 }
 0x24f   :  { %v1596_v5 = vpop.eup %1595  ;;  %v1061_v25 = vmul.f32 1.1785113, %v997_v2  ;;  %v998_v47 = vmul.f32 %v1594_v29, %v2042_v44  ;;  %1615 = vpow2.f32 %v1233_v31  ;;  %v1234_v40 = vmul.f32 -1.442695, %v2099_v35 }
 0x250   :  { %v1598_v30 = vpop.eup %1597  ;;  %v1059_v43 = vmul.f32 1.1785113, %v995_v6  ;;  %v996_v45 = vmul.f32 %v1596_v5, %v2045_v46  ;;  %1617 = vpow2.f32 %v1236_v27  ;;  %v1032_v46 = vmul.f32 0.70710677, %v1674_v8 }
 0x251   :  { %v1600_v42 = vpop.eup %1599  ;;  %v1093_v13 = vadd.f32 %v1061_v25, %v1029_v58  ;;  %v1062_v49 = vmul.f32 1.1785113, %v998_v47  ;;  %v909_v14 = vadd.f32 1.0, %v1598_v30  ;;  %1619 = vpow2.f32 %v1234_v40 }
 0x252   :  { %v1602_v10 = vpop.eup %1601  ;;  %v1091_v52 = vadd.f32 %v1059_v43, %v1027_v19  ;;  %v1060_v17 = vmul.f32 1.1785113, %v996_v45  ;;  %v907_v51 = vadd.f32 1.0, %v1600_v42  ;;  %v1677_v45 = vld [vmem:[#allocation2 + $0x80] sm:$0xff] }
 0x253   :  { %v1604_v44 = vpop.eup %1603  ;;  %1125 = vst [vmem:[#allocation8 + $0x50] sm:$0xff] %v1093_v13  ;;  %v1094_v22 = vadd.f32 %v1062_v49, %v1030_v21  ;;  %1621 = vrcp.f32 %v909_v14  ;;  %v910_v53 = vadd.f32 1.0, %v1602_v10  ;;  %v1035_v42 = vmul.f32 0.70710677, %v1677_v45  ;;  %v1678_v10 = vld [vmem:[#allocation2 + $0x90] sm:$0xff] }
 0x254   :  { %v1606_v18 = vpop.eup %1605  ;;  %1123 = vst [vmem:[#allocation8 + $0x40] sm:$0xff] %v1091_v52  ;;  %v1092_v57 = vadd.f32 %v1060_v17, %v1028_v41  ;;  %1623 = vrcp.f32 %v907_v51  ;;  %v908_v50 = vadd.f32 1.0, %v1604_v44  ;;  %v2104_v60 = vpop.f32.mrb[24].mxu1  ;;  %v1037_v52 = vmul.f32 0.70710677, %v1678_v10 }
 0x255   :  { %v1608_v62 = vpop.eup %1607  ;;  %1126 = vst [vmem:[#allocation8 + $0x58] sm:$0xff] %v1094_v22  ;;  %v1001_v36 = vmul.f32 %v1606_v18, %v2048_v59  ;;  %1625 = vrcp.f32 %v910_v53  ;;  %v1239_v7 = vmul.f32 -1.442695, %v2104_v60  ;;  %v2108_v9 = vpop.f32.mrb[25].mxu1 }
 0x256   :  { %v1610_v4 = vpop.eup %1609  ;;  %1124 = vst [vmem:[#allocation8 + $0x48] sm:$0xff] %v1092_v57  ;;  %v999_v15 = vmul.f32 %v1608_v62, %v2052_v56  ;;  %1627 = vrcp.f32 %v908_v50  ;;  %v1237_v11 = vmul.f32 -1.442695, %v2108_v9  ;;  %v2112_v33 = vpop.f32.mrb[26].mxu1 }
 0x257   :  { %v1612_v19 = vpop.eup %1611  ;;  %v1065_v24 = vmul.f32 1.1785113, %v1001_v36  ;;  %v1002_v59 = vmul.f32 %v1610_v4, %v2057_v3  ;;  %1629 = vpow2.f32 %v1239_v7  ;;  %v1240_v12 = vmul.f32 -1.442695, %v2112_v33  ;;  %v2116_v23 = vpop.f32.mrb[27].mxu1 }
 0x258   :  { %v1614_v58 = vpop.eup %1613  ;;  %v1063_v2 = vmul.f32 1.1785113, %v999_v15  ;;  %v1000_v31 = vmul.f32 %v1612_v19, %v2062_v34  ;;  %1631 = vpow2.f32 %v1237_v11  ;;  %v1238_v56 = vmul.f32 -1.442695, %v2116_v23 }
 0x259   :  { %v1616_v29 = vpop.eup %1615  ;;  %v1097_v32 = vadd.f32 %v1065_v24, %v1033_v1  ;;  %v1066_v21 = vmul.f32 1.1785113, %v1002_v59  ;;  %v913_v6 = vadd.f32 1.0, %v1614_v58  ;;  %1633 = vpow2.f32 %v1240_v12 }
 0x25a   :  { %v1618_v27 = vpop.eup %1617  ;;  %v1095_v5 = vadd.f32 %v1063_v2, %v1031_v55  ;;  %v1064_v3 = vmul.f32 1.1785113, %v1000_v31  ;;  %v911_v25 = vadd.f32 1.0, %v1616_v29  ;;  %1635 = vpow2.f32 %v1238_v56  ;;  %v1679_v55 = vld [vmem:[#allocation2 + $0x98] sm:$0xff]  ;;  %v1681_v56 = vld [vmem:[#allocation2 + $0xb0] sm:$0xff] }
 0x25b   :  { %v1620_v47 = vpop.eup %1619  ;;  %1129 = vst [vmem:[#allocation8 + $0x70] sm:$0xff] %v1097_v32  ;;  %v1098_v40 = vadd.f32 %v1066_v21, %v1034_v38  ;;  %1637 = vrcp.f32 %v913_v6  ;;  %v914_v30 = vadd.f32 1.0, %v1618_v27  ;;  %v1038_v22 = vmul.f32 0.70710677, %v1679_v55  ;;  %v1682_v6 = vld [vmem:[#allocation2 + $0xa0] sm:$0xff] }
 0x25c   :  { %1127 = vst [vmem:[#allocation8 + $0x60] sm:$0xff] %v1095_v5  ;;  %v1096_v34 = vadd.f32 %v1064_v3, %v1032_v46  ;;  %1639 = vrcp.f32 %v911_v25  ;;  %v912_v37 = vadd.f32 1.0, %v1620_v47  ;;  %v2120_v41 = vpop.f32.mrb[28].mxu1  ;;  %v1036_v1 = vmul.f32 0.70710677, %v1680_v63  ;;  %v1683_v25 = vld [vmem:[#allocation2 + $0xb8] sm:$0xff] }
 0x25d   :  { %v1622_v43 = vpop.eup %1621  ;;  %1130 = vst [vmem:[#allocation8 + $0x78] sm:$0xff] %v1098_v40  ;;  %1641 = vrcp.f32 %v914_v30  ;;  %v1243_v13 = vmul.f32 -1.442695, %v2120_v41  ;;  %v2123_v49 = vpop.f32.mrb[29].mxu1  ;;  %v1041_v29 = vmul.f32 0.70710677, %v1681_v56 }
 0x25e   :  { %v1624_v14 = vpop.eup %1623  ;;  %1128 = vst [vmem:[#allocation8 + $0x68] sm:$0xff] %v1096_v34  ;;  %v1005_v17 = vmul.f32 %v1622_v43, %v2070_v39  ;;  %1643 = vrcp.f32 %v912_v37  ;;  %v1241_v51 = vmul.f32 -1.442695, %v2123_v49  ;;  %v2127_v44 = vpop.f32.mrb[30].mxu1  ;;  %v1039_v27 = vmul.f32 0.70710677, %v1682_v6 }
 0x25f   :  { %v1626_v61 = vpop.eup %1625  ;;  %v1003_v53 = vmul.f32 %v1624_v14, %v2075_v48  ;;  %1645 = vpow2.f32 %v1243_v13  ;;  %v1244_v18 = vmul.f32 -1.442695, %v2127_v44  ;;  %v2131_v8 = vpop.f32.mrb[31].mxu1  ;;  %v1042_v47 = vmul.f32 0.70710677, %v1683_v25  ;;  %v1684_v37 = vld [vmem:[#allocation2 + $0xa8] sm:$0xff] }
 0x260   :  { %v1628_v46 = vpop.eup %1627  ;;  %v1069_v57 = vmul.f32 1.1785113, %v1005_v17  ;;  %v1006_v50 = vmul.f32 %v1626_v61, %v2080_v16  ;;  %1647 = vpow2.f32 %v1241_v51  ;;  %v1242_v39 = vmul.f32 -1.442695, %v2131_v8  ;;  %v1691_v6 = vld [vmem:[#allocation2 + $0xf8] sm:$0xff] }
 0x261   :  { %v1630_v62 = vpop.eup %1629  ;;  %v1067_v36 = vmul.f32 1.1785113, %v1003_v53  ;;  %v1004_v7 = vmul.f32 %v1628_v46, %v2084_v54  ;;  %1649 = vpow2.f32 %v1244_v18  ;;  %v1040_v43 = vmul.f32 0.70710677, %v1684_v37  ;;  %v1685_v46 = vld [vmem:[#allocation2 + $0xd0] sm:$0xff] }
 0x262   :  { %v1632_v48 = vpop.eup %1631  ;;  %v1101_v4 = vadd.f32 %v1069_v57, %v1037_v52  ;;  %v1070_v0 = vmul.f32 1.1785113, %v1006_v50  ;;  %v917_v38 = vadd.f32 1.0, %v1630_v62  ;;  %1651 = vpow2.f32 %v1242_v39  ;;  %v1686_v62 = vld [vmem:[#allocation2 + $0xc0] sm:$0xff] }
 0x263   :  { %v1634_v15 = vpop.eup %1633  ;;  %v1099_v11 = vadd.f32 %v1067_v36, %v1035_v42  ;;  %v1068_v19 = vmul.f32 1.1785113, %v1004_v7  ;;  %v915_v24 = vadd.f32 1.0, %v1632_v48  ;;  %v1045_v57 = vmul.f32 0.70710677, %v1685_v46  ;;  %v1687_v7 = vld [vmem:[#allocation2 + $0xd8] sm:$0xff] }
 0x264   :  { %v1636_v16 = vpop.eup %1635  ;;  %1133 = vst [vmem:[#allocation8 + $0x90] sm:$0xff] %v1101_v4  ;;  %v1102_v59 = vadd.f32 %v1070_v0, %v1038_v22  ;;  %1653 = vrcp.f32 %v917_v38  ;;  %v918_v12 = vadd.f32 1.0, %v1634_v15  ;;  %v1043_v63 = vmul.f32 0.70710677, %v1686_v62  ;;  %v1688_v38 = vld [vmem:[#allocation2 + $0xc8] sm:$0xff] }
 0x265   :  { %v1638_v58 = vpop.eup %1637  ;;  %1131 = vst [vmem:[#allocation8 + $0x80] sm:$0xff] %v1099_v11  ;;  %v1100_v2 = vadd.f32 %v1068_v19, %v1036_v1  ;;  %1655 = vrcp.f32 %v915_v24  ;;  %v916_v54 = vadd.f32 1.0, %v1636_v16  ;;  %v1046_v48 = vmul.f32 0.70710677, %v1687_v7 }
 0x266   :  { %v1640_v31 = vpop.eup %1639  ;;  %1134 = vst [vmem:[#allocation8 + $0x98] sm:$0xff] %v1102_v59  ;;  %v1009_v32 = vmul.f32 %v1638_v58, %v2088_v26  ;;  %1657 = vrcp.f32 %v918_v12  ;;  %v1044_v15 = vmul.f32 0.70710677, %v1688_v38 }
 0x267   :  { %v1642_v21 = vpop.eup %1641  ;;  %1132 = vst [vmem:[#allocation8 + $0x88] sm:$0xff] %v1100_v2  ;;  %v1007_v5 = vmul.f32 %v1640_v31, %v2091_v20  ;;  %1659 = vrcp.f32 %v916_v54  ;;  %v1689_v54 = vld [vmem:[#allocation2 + $0xf0] sm:$0xff] }
 0x268   :  { %v1644_v3 = vpop.eup %1643  ;;  %v1073_v40 = vmul.f32 1.1785113, %v1009_v32  ;;  %v1010_v30 = vmul.f32 %v1642_v21, %v2095_v28  ;;  %v1049_v31 = vmul.f32 0.70710677, %v1689_v54 }
 0x269   :  { %v1646_v34 = vpop.eup %1645  ;;  %v1071_v45 = vmul.f32 1.1785113, %v1007_v5  ;;  %v1008_v26 = vmul.f32 %v1644_v3, %v2099_v35 }
 0x26a   :  { %v1648_v42 = vpop.eup %1647  ;;  %v1105_v13 = vadd.f32 %v1073_v40, %v1041_v29  ;;  %v1074_v14 = vmul.f32 1.1785113, %v1010_v30  ;;  %v921_v10 = vadd.f32 1.0, %v1646_v34  ;;  %v1690_v29 = vld [vmem:[#allocation2 + $0xe0] sm:$0xff]  ;;  %v1692_v40 = vld [vmem:[#allocation2 + $0xe8] sm:$0xff] }
 0x26b   :  { %v1650_v52 = vpop.eup %1649  ;;  %v1103_v17 = vadd.f32 %v1071_v45, %v1039_v27  ;;  %v1072_v20 = vmul.f32 1.1785113, %v1008_v26  ;;  %v919_v51 = vadd.f32 1.0, %v1648_v42  ;;  %v1047_v32 = vmul.f32 0.70710677, %v1690_v29 }
 0x26c   :  { %v1652_v61 = vpop.eup %1651  ;;  %1137 = vst [vmem:[#allocation8 + $0xb0] sm:$0xff] %v1105_v13  ;;  %v1106_v55 = vadd.f32 %v1074_v14, %v1042_v47  ;;  %1661 = vrcp.f32 %v921_v10  ;;  %v922_v22 = vadd.f32 1.0, %v1650_v52  ;;  %v1050_v27 = vmul.f32 0.70710677, %v1691_v6 }
 0x26d   :  { %1135 = vst [vmem:[#allocation8 + $0xa0] sm:$0xff] %v1103_v17  ;;  %v1104_v28 = vadd.f32 %v1072_v20, %v1040_v43  ;;  %1663 = vrcp.f32 %v919_v51  ;;  %v920_v53 = vadd.f32 1.0, %v1652_v61  ;;  %v1048_v30 = vmul.f32 0.70710677, %v1692_v40 }
 0x26e   :  { %v1654_v18 = vpop.eup %1653  ;;  %1138 = vst [vmem:[#allocation8 + $0xb8] sm:$0xff] %v1106_v55  ;;  %1665 = vrcp.f32 %v922_v22 }
 0x26f   :  { %v1656_v35 = vpop.eup %1655  ;;  %1136 = vst [vmem:[#allocation8 + $0xa8] sm:$0xff] %v1104_v28  ;;  %v1013_v50 = vmul.f32 %v1654_v18, %v2104_v60  ;;  %1667 = vrcp.f32 %v920_v53 }
 0x270   :  { %v1658_v39 = vpop.eup %1657  ;;  %v1011_v1 = vmul.f32 %v1656_v35, %v2108_v9 }
 0x271   :  { %v1660_v36 = vpop.eup %1659  ;;  %v1077_v4 = vmul.f32 1.1785113, %v1013_v50  ;;  %v1014_v0 = vmul.f32 %v1658_v39, %v2112_v33 }
 0x272   :  { %v1075_v11 = vmul.f32 1.1785113, %v1011_v1  ;;  %v1012_v19 = vmul.f32 %v1660_v36, %v2116_v23 }
 0x273   :  { %v1109_v24 = vadd.f32 %v1077_v4, %v1045_v57  ;;  %v1078_v16 = vmul.f32 1.1785113, %v1014_v0 }
 0x274   :  { %v1107_v60 = vadd.f32 %v1075_v11, %v1043_v63  ;;  %v1076_v59 = vmul.f32 1.1785113, %v1012_v19 }
 0x275   :  { %1141 = vst [vmem:[#allocation8 + $0xd0] sm:$0xff] %v1109_v24  ;;  %v1110_v12 = vadd.f32 %v1078_v16, %v1046_v48 }
 0x276   :  { %v1662_v58 = vpop.eup %1661  ;;  %1139 = vst [vmem:[#allocation8 + $0xc0] sm:$0xff] %v1107_v60  ;;  %v1108_v9 = vadd.f32 %v1076_v59, %v1044_v15 }
 0x277   :  { %v1664_v2 = vpop.eup %1663  ;;  %1142 = vst [vmem:[#allocation8 + $0xd8] sm:$0xff] %v1110_v12  ;;  %v1017_v33 = vmul.f32 %v1662_v58, %v2120_v41 }
 0x278   :  { %v1666_v56 = vpop.eup %1665  ;;  %1140 = vst [vmem:[#allocation8 + $0xc8] sm:$0xff] %v1108_v9  ;;  %v1015_v23 = vmul.f32 %v1664_v2, %v2123_v49 }
 0x279   :  { %v1668_v21 = vpop.eup %1667  ;;  %v1081_v5 = vmul.f32 1.1785113, %v1017_v33  ;;  %v1018_v3 = vmul.f32 %v1666_v56, %v2127_v44 }
 0x27a   :  { %v1079_v25 = vmul.f32 1.1785113, %v1015_v23  ;;  %v1016_v47 = vmul.f32 %v1668_v21, %v2131_v8 }
 0x27b   :  { %v1113_v34 = vadd.f32 %v1081_v5, %v1049_v31  ;;  %v1082_v37 = vmul.f32 1.1785113, %v1018_v3 }
 0x27c   :  { %v1111_v41 = vadd.f32 %v1079_v25, %v1047_v32  ;;  %v1080_v43 = vmul.f32 1.1785113, %v1016_v47 }
 0x27d   :  { %1145 = vst [vmem:[#allocation8 + $0xf0] sm:$0xff] %v1113_v34  ;;  %v1114_v45 = vadd.f32 %v1082_v37, %v1050_v27 }
 0x27e   :  { %1143 = vst [vmem:[#allocation8 + $0xe0] sm:$0xff] %v1111_v41  ;;  %v1112_v49 = vadd.f32 %v1080_v43, %v1048_v30 }
 0x27f   :  { %1146 = vst [vmem:[#allocation8 + $0xf8] sm:$0xff] %v1114_v45 }
 0x280   :  { %1144 = vst [vmem:[#allocation8 + $0xe8] sm:$0xff] %v1112_v49 }
 0x281   :  { %1770 = shalt.err (!%p1767_p0)
}
 0x282   :  { %s1771_s27 = scalar_lea.hbm %s2166_s3, 4096 }
 0x283   :  { %p1772_p1 = scmp.ne.s32.totalorder %s2166_s3, %s1771_s27  ;;  %p1775_p2 = scmp.lt.u32.totalorder %s1771_s27, %s2166_s3 }
 0x285   :  { %p1777_p3 = pnand %p1775_p2, %p1772_p1 }
 0x287   :  { %1780 = shalt.err (!%p1777_p3)
}
 0x288   :  { %1158 = dma.vmem_to_hbm [thread:$0]  %s1153_s22, 4096, %s2166_s3, [#allocation4], %s1791_s1, %s1791_s1, %s1792_s9  }
 0x289   :  { %1785 = dma.done.wait [#allocation4], 4096  }
 0x28a   :  { %1786 = vsyncadd [#allocation4], 4294963200 }
 0x28b   :  { %1162 = vsyncpa [#allocation3], 1 }
 0x28c   :  { %1163 = vsyncpa [#allocation6], 1 }
 0x28d   :  { %1164 = vsyncpa [#allocation4], 1 }

</bundles_post_ra>
